<compile_context>
chip_gen: v5e
topology: v5e:2x2
jax: 0.10.0
libtpu: 0.0.40
codegen_flags: <defaults>
</compile_context>

<pallas_src>
import functools

import jax
import jax.numpy as jnp
from jax.experimental import pallas as pl
from jax.experimental.pallas import tpu as pltpu

_LANES = 128
_MAX_SINGLE_BLOCK_ROWS = 4096   # 4096*128*4B = 2 MiB / input -> one grid step
_TILE_ROWS = 2048               # 2048*128*4B = 1 MiB / input buffer (tiled path)


def _mse_single_block_kernel(x_ref, y_ref, o_ref, *, scale):
    """Whole problem in one block: o = scale * sum((x - y)^2)."""
    d = x_ref[...].astype(jnp.float32) - y_ref[...].astype(jnp.float32)
    o_ref[0, 0] = jnp.sum(d * d) * jnp.float32(scale)


def _mse_tiled_kernel(x_ref, y_ref, o_ref, acc_ref, *, scale, valid_rows,
                      tile_rows, steps_per_split):
    """Per-split partial sum: VMEM vector accumulate (VPU) per step, one
    cross-lane/sublane reduce + scale on the final reduction step."""
    p = pl.program_id(0)   # parallel split (per-TensorCore on v7x)
    j = pl.program_id(1)   # sequential reduction step

    @pl.when(j == 0)
    def _():
        acc_ref[...] = jnp.zeros_like(acc_ref)

    d = x_ref[...].astype(jnp.float32) - y_ref[...].astype(jnp.float32)
    sq = d * d

    # Mask rows of the (possibly ragged / out-of-bounds) final block.
    row = jax.lax.broadcasted_iota(jnp.int32, sq.shape, dimension=0)
    global_row = (p * steps_per_split + j) * tile_rows + row
    sq = jnp.where(global_row < valid_rows, sq, jnp.float32(0.0))

    acc_ref[...] += sq   # pure VPU accumulate; no per-step XLU reduce

    @pl.when(j == pl.num_programs(1) - 1)
    def _():
        o_ref[0, 0] = jnp.sum(acc_ref[...]) * jnp.float32(scale)


def standard_loss_wrapper(x, ground_truth, norm=1.0):
    """JAX/Pallas equivalent of StandardLossWrapper(norm, MSELoss()).forward."""
    assert x.shape == ground_truth.shape, "x and ground_truth must match"
    n_elems = x.size
    scale = float(norm) / float(n_elems)

    # Keep native dtype for the DMA; upcast happens inside the kernel.
    flat_x = x.reshape(-1)
    flat_y = ground_truth.reshape(-1)

    # Lane-dense [M, 128] slab.  Only pad up to the lane width (<=127 elems);
    # zero-padding both operands contributes 0 to the squared-error sum.
    rem = flat_x.shape[0] % _LANES
    if rem:
        pad = _LANES - rem
        flat_x = jnp.pad(flat_x, (0, pad))
        flat_y = jnp.pad(flat_y, (0, pad))
    m = flat_x.shape[0] // _LANES
    x2d = flat_x.reshape(m, _LANES)
    y2d = flat_y.reshape(m, _LANES)

    if m <= _MAX_SINGLE_BLOCK_ROWS:
        # Single-step fast path: no accumulator round-trip, no pl.when.
        kernel = functools.partial(_mse_single_block_kernel, scale=scale)
        out = pl.pallas_call(
            kernel,
            out_shape=jax.ShapeDtypeStruct((1, 1), jnp.float32),
            grid_spec=pltpu.PrefetchScalarGridSpec(
                num_scalar_prefetch=0,
                grid=(1,),
                in_specs=[
                    pl.BlockSpec((m, _LANES), lambda i: (0, 0)),
                    pl.BlockSpec((m, _LANES), lambda i: (0, 0)),
                ],
                out_specs=pl.BlockSpec((1, 1), lambda i: (0, 0),
                                       memory_space=pltpu.SMEM),
            ),
            compiler_params=pltpu.CompilerParams(
                dimension_semantics=("arbitrary",)),
        )(x2d, y2d)
        return out[0, 0]

    # Large-input path: pipelined row tiles + per-split VMEM accumulator.
    tile_rows = _TILE_ROWS
    total_blocks = (m + tile_rows - 1) // tile_rows
    # 2-way parallel split (per-TC on v7x) only when blocks divide evenly so
    # every index_map result stays in bounds; serial-loop-equivalent on 1-TC.
    num_splits = 2 if (total_blocks % 2 == 0) else 1
    steps_per_split = total_blocks // num_splits

    kernel = functools.partial(
        _mse_tiled_kernel, scale=scale, valid_rows=m,
        tile_rows=tile_rows, steps_per_split=steps_per_split)

    def block_map(p, j):
        return (p * steps_per_split + j, 0)

    out = pl.pallas_call(
        kernel,
        out_shape=jax.ShapeDtypeStruct((num_splits, 1), jnp.float32),
        grid_spec=pltpu.PrefetchScalarGridSpec(
            num_scalar_prefetch=0,
            grid=(num_splits, steps_per_split),
            in_specs=[
                pl.BlockSpec((tile_rows, _LANES), block_map),
                pl.BlockSpec((tile_rows, _LANES), block_map),
            ],
            out_specs=pl.BlockSpec((1, 1), lambda p, j: (p, 0),
                                   memory_space=pltpu.SMEM),
            scratch_shapes=[pltpu.VMEM((tile_rows, _LANES), jnp.float32)],
        ),
        compiler_params=pltpu.CompilerParams(
            dimension_semantics=("parallel", "arbitrary")),
    )(x2d, y2d)
    # Each split already carries `scale`; summing partials gives the full loss.
    return jnp.sum(out)


if __name__ == "__main__":
    key = jax.random.PRNGKey(0)
    kx, ky, kbx, kby = jax.random.split(key, 4)

    # --- main (small) example: NCHW activation tensor, single-block path ---
    x = jax.random.normal(kx, (2, 4, 16, 16), dtype=jnp.float32)          # batch.x
    ground_truth = jax.random.normal(ky, (2, 4, 16, 16), dtype=jnp.float32)
    norm = 0.5

    result = standard_loss_wrapper(x, ground_truth, norm=norm)
    jax.block_until_ready(result)

    ref = norm * jnp.mean((x - ground_truth) ** 2)
    assert jnp.allclose(result, ref, rtol=1e-5, atol=1e-6), (result, ref)

    # --- secondary check: exercises the tiled / parallel-split / masked path
    #     with native (bf16) DMA dtype and a ragged tail ---
    n_big = 786_460   # -> 6145 rows of 128 lanes: 4 blocks, 2 splits, ragged tail
    xb = jax.random.normal(kbx, (n_big,), dtype=jnp.float32).astype(jnp.bfloat16)
    yb = jax.random.normal(kby, (n_big,), dtype=jnp.float32).astype(jnp.bfloat16)
    norm_b = 2.0

    result_b = standard_loss_wrapper(xb, yb, norm=norm_b)
    jax.block_until_ready(result_b)

    ref_b = norm_b * jnp.mean(
        (xb.astype(jnp.float32) - yb.astype(jnp.float32)) ** 2)
    assert jnp.allclose(result_b, ref_b, rtol=1e-3, atol=1e-6), (result_b, ref_b)

    print("KERNEL_OK")
</pallas_src>

<mosaic_0001>
module attributes {stable_mosaic.version = 11 : i64} {
  func.func @_mse_single_block_kernel(%arg0: i32, %arg1: memref<16x128xf32, #tpu.memory_space<vmem>>, %arg2: memref<16x128xf32, #tpu.memory_space<vmem>>, %arg3: memref<1x1xf32, #tpu.memory_space<smem>>) attributes {dimension_semantics = [#tpu.dimension_semantics<arbitrary>], iteration_bounds = array<i64: 1>, scalar_prefetch = 0 : i64, scratch_operands = 0 : i64, tpu.core_type = #tpu.core_type<tc>, window_params = [{pipeline_mode = #tpu.pipeline_mode<synchronous>, transform_indices = @transform_0, window_bounds = array<i64: 16, 128>}, {pipeline_mode = #tpu.pipeline_mode<synchronous>, transform_indices = @transform_1, window_bounds = array<i64: 16, 128>}, {transform_indices = @transform_2, window_bounds = array<i64: 1, 1>}]} {
    %c0 = arith.constant 0 : index
    %c0_0 = arith.constant 0 : index
    %0 = vector.load %arg1[%c0, %c0_0] : memref<16x128xf32, #tpu.memory_space<vmem>>, vector<16x128xf32>
    %c0_1 = arith.constant 0 : index
    %c0_2 = arith.constant 0 : index
    %1 = vector.load %arg2[%c0_1, %c0_2] : memref<16x128xf32, #tpu.memory_space<vmem>>, vector<16x128xf32>
    %2 = arith.subf %0, %1 : vector<16x128xf32>
    %3 = arith.mulf %2, %2 : vector<16x128xf32>
    %4 = vector.shape_cast %3 : vector<16x128xf32> to vector<1x16x128xf32>
    %cst = arith.constant dense<0.000000e+00> : vector<1xf32>
    %5 = vector.multi_reduction <add>, %4, %cst [1, 2] : vector<1x16x128xf32> to vector<1xf32>
    %6 = vector.shape_cast %5 : vector<1xf32> to vector<1x1x1xf32>
    %7 = vector.extract %6[0, 0, 0] : f32 from vector<1x1x1xf32>
    %cst_3 = arith.constant 2.44140625E-4 : f32
    %8 = arith.mulf %7, %cst_3 : f32
    %c0_4 = arith.constant 0 : index
    %c0_5 = arith.constant 0 : index
    %9 = memref.load %arg3[%c0_4, %c0_5] : memref<1x1xf32, #tpu.memory_space<smem>>
    memref.store %8, %arg3[%c0_4, %c0_5] : memref<1x1xf32, #tpu.memory_space<smem>>
    return
  }
  func.func @transform_0(%arg0: i32) -> (i32, i32) {
    %c0_i32 = arith.constant 0 : i32
    %c0_i32_0 = arith.constant 0 : i32
    %c0_i32_1 = arith.constant 0 : i32
    return %c0_i32, %c0_i32_0 : i32, i32
  }
  func.func @transform_1(%arg0: i32) -> (i32, i32) {
    %c0_i32 = arith.constant 0 : i32
    %c0_i32_0 = arith.constant 0 : i32
    %c0_i32_1 = arith.constant 0 : i32
    return %c0_i32, %c0_i32_0 : i32, i32
  }
  func.func @transform_2(%arg0: i32) -> (i32, i32) {
    %c0_i32 = arith.constant 0 : i32
    %c0_i32_0 = arith.constant 0 : i32
    %c0_i32_1 = arith.constant 0 : i32
    return %c0_i32, %c0_i32_0 : i32, i32
  }
}

</mosaic_0001>

<bundles_post_ra>
// kernel: tpu_custom_call.1
= control target key start
LH: loop header
LB: loop body
LE: loop exit
PB: predicated region body
PF: predicated region fallthrough
CT: control target
= control target key end

     0   :  { %7 = vsyncpa [#allocation3], 0  ;;  %s184_s0 = inlined_call_operand.hbm [shape: f32[16,128], index: 0, kind: input, shape index: {}]   ;;  %s185_s1 = inlined_call_operand.hbm [shape: f32[16,128], index: 1, kind: input, shape index: {}]   ;;  %s186_s2 = inlined_call_operand.hbm [shape: f32[1,1], index: 2, kind: output, shape index: {}]  }
   0x1   :  { %8 = vsyncpa [#allocation6], 0 }
   0x2   :  { %9 = vsyncpa [#allocation4], 0  ;;  %s14_s11 = sshll.u32 %s184_s0, 4  ;;  %s155_s12 = smov [#allocation2]   ;;  %s15_s11 = int_to_ptr.hbm [resolvable:$true] %s14_s11 }
   0x3   :  { %s16_s13 = sshll.u32 %s155_s12, 4  ;;  %s27_s16 = sshll.u32 %s185_s1, 4  ;;  %s17_s13 = int_to_ptr.vmem [resolvable:$true] %s16_s13  ;;  %s28_s16 = int_to_ptr.hbm [resolvable:$true] %s27_s16 }
   0x4   :  { %s156_s17 = smov 128   ;;  %s157_s18 = smov 8  }
   0x5   :  { %22 = dma.hbm_to_vmem [thread:$0]  %s15_s11, 256, %s17_s13, [#allocation3], %s156_s17, %s156_s17, %s157_s18  }
   0x6   :  { %s158_s19 = smov [#allocation5]  }
   0x7   :  { %s29_s20 = sshll.u32 %s158_s19, 4  ;;  %s30_s20 = int_to_ptr.vmem [resolvable:$true] %s29_s20 }
   0x8   :  { %35 = dma.hbm_to_vmem [thread:$0]  %s28_s16, 256, %s30_s20, [#allocation6], %s156_s17, %s156_s17, %s157_s18  }
   0x9   :  { %149 = dma.done.wait [#allocation3], 256  }
   0xa   :  { %150 = vsyncadd [#allocation3], 4294967040 }
   0xb   :  { %151 = dma.done.wait [#allocation6], 256  }
   0xc   :  { %152 = vsyncadd [#allocation6], 4294967040  ;;  %v44_v0 = vld [vmem:[#allocation2] sm:$0xff]  ;;  %v45_v1 = vld [vmem:[#allocation2 + $0x8] sm:$0xff]  ;;  %s70_s21 = sshll.u32 %s186_s2, 4  ;;  %s159_s24 = smov [#allocation7]   ;;  %s71_s21 = int_to_ptr.hbm [resolvable:$true] %s70_s21 }
   0xd   :  { %v46_v2 = vld [vmem:[#allocation5] sm:$0xff]  ;;  %v47_v3 = vld [vmem:[#allocation5 + $0x8] sm:$0xff] }
   0xe   :  { %v48_v4 = vsub.f32 %v44_v0, %v46_v2  ;;  %v49_v5 = vsub.f32 %v45_v1, %v47_v3 }
  0x10   :  { %v50_v6 = vmul.f32 %v48_v4, %v48_v4  ;;  %v51_v7 = vmul.f32 %v49_v5, %v49_v5 }
  0x12   :  { %v52_v8 = vadd.f32 %v51_v7, %v50_v6 }
  0x14   :  { %53 = vadd.xlane.f32.xlu0 %v52_v8 }
  0x87   :  { %v54_v9 = vpop.xlane.xlu0 %53 }
  0x88   :  { %v55_v10 = vrot.slane %v54_v9, 4 }
  0x8a   :  { %v56_v11 = vadd.f32 %v55_v10, %v54_v9 }
  0x8c   :  { %v57_v12 = vrot.slane %v56_v11, 2 }
  0x8e   :  { %v58_v13 = vadd.f32 %v57_v12, %v56_v11 }
  0x90   :  { %v59_v14 = vrot.slane %v58_v13, 1 }
  0x92   :  { %v60_v15 = vadd.f32 %v59_v14, %v58_v13 }
  0x94   :  { %82 = vpush %v60_v15 }
  0xc5   :  { %s83_s22 = spop %82 }
  0xc6   :  { %s62_s23 = smul.f32 0.00024414063, %s83_s22 }
  0xc8   :  { %64 = sst [smem:[#allocation7]] %s62_s23 }
  0xc9   :  { %73 = dma.smem_to_hbm %s159_s24, 16, %s71_s21, [#allocation4]  }
  0xca   :  { %153 = dma.done.wait [#allocation4], 16  }
  0xcb   :  { %154 = vsyncadd [#allocation4], 4294967280 }
  0xcc   :  { %78 = sfence }
  0xcd   :  { %79 = vsyncpa [#allocation3], 1 }
  0xce   :  { %80 = vsyncpa [#allocation6], 1 }
  0xcf   :  { %81 = vsyncpa [#allocation4], 1 }

</bundles_post_ra>
